<compile_context>
chip_gen: v7x
topology: tpu7x:2x2x1
jax: 0.10.0
libtpu: 0.0.40
codegen_flags: <defaults>
</compile_context>

<pallas_src>
import functools

import jax
import jax.numpy as jnp
from jax import lax
from jax.experimental import pallas as pl
from jax.experimental.pallas import tpu as pltpu


def _add_and_norm_kernel(x_ref, r_ref, g_ref, b_ref, o_ref, *, eps, d_model):
    # "Add": residual add directly in f32 (no bf16 pre-round; cheaper on v5e).
    s = x_ref[...].astype(jnp.float32) + r_ref[...].astype(jnp.float32)
    inv_d = jnp.float32(1.0 / d_model)
    # Two-pass mean / variance over the feature axis (robust to large |mean|).
    mean = jnp.sum(s, axis=-1, keepdims=True) * inv_d
    centered = s - mean
    var = jnp.sum(centered * centered, axis=-1, keepdims=True) * inv_d
    inv = lax.rsqrt(var + jnp.float32(eps))
    # Affine: gamma/beta arrive pre-cast to f32 and broadcast over rows.
    y = centered * inv * g_ref[...] + b_ref[...]
    o_ref[...] = y.astype(o_ref.dtype)


def _vmem_budgets():
    """(pipeline_budget_bytes, vmem_limit_cap_bytes) per chip generation."""
    try:
        vmem_cap = int(pltpu.get_tpu_info().vmem_capacity_bytes)
    except Exception:
        vmem_cap = 64 << 20  # conservative fallback (v7x per-TC size)
    if vmem_cap >= (100 << 20):   # v5e / v6e: 128 MiB VMEM
        return 24 << 20, 64 << 20
    return 8 << 20, 40 << 20      # v7x: 64 MiB per TensorCore


def add_and_norm(x, residual, gamma, beta, *, eps=1e-5):
    """LayerNorm(x + residual) over the last dim, matching torch.nn.LayerNorm."""
    assert x.shape == residual.shape
    d_model = x.shape[-1]
    orig_shape = x.shape
    out_dtype = x.dtype

    x2 = x.reshape(-1, d_model)
    r2 = residual.reshape(-1, d_model)
    rows = x2.shape[0]

    # Params: pre-cast to f32 once in the wrapper (negligible HBM bytes).
    g2 = gamma.reshape(1, d_model).astype(jnp.float32)
    b2 = beta.reshape(1, d_model).astype(jnp.float32)

    itemsize = jnp.dtype(out_dtype).itemsize
    pipeline_budget, vmem_limit_cap = _vmem_budgets()

    # Per-row pipelined footprint:
    #   3 streams (x, r, out) * 2 DMA buffers * itemsize
    #   + ~3 live f32 intermediates inside the kernel (s, centered, y).
    bytes_per_row = (3 * 2 * itemsize + 3 * 4) * d_model
    tr = int(pipeline_budget // bytes_per_row)
    tr = max(8, min(tr, 2048))
    tr -= tr % 8                          # keep the sublane dim 8-aligned

    # Keep >= ~8 grid steps so v7x's two TensorCores stay busy/balanced.
    min_steps = 8
    tr_for_steps = -(-rows // min_steps)              # ceil(rows / min_steps)
    tr_for_steps = ((tr_for_steps + 7) // 8) * 8      # round up to sublane mult
    tr = min(tr, max(8, tr_for_steps))

    rows_rounded = ((rows + 7) // 8) * 8
    tr = min(tr, rows_rounded)            # don't over-tile tiny inputs
    tr = max(tr, 8)

    grid = (pl.cdiv(rows, tr),)           # boundary block is masked on write

    # Declared VMEM limit: streams + f32 intermediates + params, with slack,
    # capped per generation (well under v7x's 64 MiB per TC).
    pipelined_bytes = bytes_per_row * tr + 2 * 2 * d_model * 4
    vmem_limit = int(min(max(pipelined_bytes * 3 // 2, 32 << 20), vmem_limit_cap))

    cost = pl.CostEstimate(
        flops=int(8 * rows * d_model),
        transcendentals=int(rows),
        bytes_accessed=int(3 * rows * d_model * itemsize + 2 * d_model * 4),
    )

    kernel = functools.partial(_add_and_norm_kernel, eps=eps, d_model=d_model)

    out = pl.pallas_call(
        kernel,
        out_shape=jax.ShapeDtypeStruct((rows, d_model), out_dtype),
        grid_spec=pltpu.PrefetchScalarGridSpec(
            num_scalar_prefetch=0,
            grid=grid,
            in_specs=[
                pl.BlockSpec((tr, d_model), lambda i: (i, 0)),
                pl.BlockSpec((tr, d_model), lambda i: (i, 0)),
                pl.BlockSpec((1, d_model), lambda i: (0, 0)),
                pl.BlockSpec((1, d_model), lambda i: (0, 0)),
            ],
            out_specs=pl.BlockSpec((tr, d_model), lambda i: (i, 0)),
        ),
        compiler_params=pltpu.CompilerParams(
            dimension_semantics=("parallel",),
            vmem_limit_bytes=vmem_limit,
        ),
        cost_estimate=cost,
    )(x2, r2, g2, b2)

    return out.reshape(orig_shape)


def _reference(x, residual, gamma, beta, eps=1e-5):
    s = (x + residual).astype(jnp.float32)
    mean = jnp.mean(s, axis=-1, keepdims=True)
    var = jnp.mean((s - mean) ** 2, axis=-1, keepdims=True)
    y = (s - mean) / jnp.sqrt(var + eps) * gamma.astype(jnp.float32) + beta.astype(jnp.float32)
    return y.astype(x.dtype)


if __name__ == "__main__":
    key = jax.random.PRNGKey(0)
    k1, k2 = jax.random.split(key)

    # Small shapes consistent with the module: (batch, seq, d_model).
    batch, seq, d_model = 2, 8, 32
    x = jax.random.normal(k1, (batch, seq, d_model), dtype=jnp.float32)
    residual = jax.random.normal(k2, (batch, seq, d_model), dtype=jnp.float32)

    # Parameter init matching nn.LayerNorm defaults (weight=1, bias=0).
    gamma = jnp.ones((d_model,), dtype=jnp.float32)
    beta = jnp.zeros((d_model,), dtype=jnp.float32)

    out = add_and_norm(x, residual, gamma, beta)
    out = jax.block_until_ready(out)
    ref = _reference(x, residual, gamma, beta)
    assert jnp.allclose(out, ref, atol=1e-5, rtol=1e-5), "mismatch vs reference"

    # Ragged-boundary check: rows % tr != 0 exercises the masked partial block.
    k3, k4 = jax.random.split(k1)
    xb = jax.random.normal(k3, (3, 5, d_model), dtype=jnp.float32)
    rb = jax.random.normal(k4, (3, 5, d_model), dtype=jnp.float32)
    out_b = jax.block_until_ready(add_and_norm(xb, rb, gamma, beta))
    ref_b = _reference(xb, rb, gamma, beta)
    assert jnp.allclose(out_b, ref_b, atol=1e-5, rtol=1e-5), "ragged mismatch"

    print("KERNEL_OK")
</pallas_src>

<mosaic_0001>
module attributes {stable_mosaic.version = 11 : i64} {
  func.func @_add_and_norm_kernel(%arg0: i32, %arg1: memref<8x32xf32, #tpu.memory_space<vmem>>, %arg2: memref<8x32xf32, #tpu.memory_space<vmem>>, %arg3: memref<1x32xf32, #tpu.memory_space<vmem>>, %arg4: memref<1x32xf32, #tpu.memory_space<vmem>>, %arg5: memref<8x32xf32, #tpu.memory_space<vmem>>) attributes {dimension_semantics = [#tpu.dimension_semantics<parallel>], iteration_bounds = array<i64: 2>, scalar_prefetch = 0 : i64, scratch_operands = 0 : i64, tpu.core_type = #tpu.core_type<tc>, window_params = [{transform_indices = @transform_0, window_bounds = array<i64: 8, 32>}, {transform_indices = @transform_1, window_bounds = array<i64: 8, 32>}, {pipeline_mode = #tpu.pipeline_mode<synchronous>, transform_indices = @transform_2, window_bounds = array<i64: 1, 32>}, {pipeline_mode = #tpu.pipeline_mode<synchronous>, transform_indices = @transform_3, window_bounds = array<i64: 1, 32>}, {transform_indices = @transform_4, window_bounds = array<i64: 8, 32>}]} {
    %c0 = arith.constant 0 : index
    %c0_0 = arith.constant 0 : index
    %0 = vector.load %arg1[%c0, %c0_0] : memref<8x32xf32, #tpu.memory_space<vmem>>, vector<8x32xf32>
    %c0_1 = arith.constant 0 : index
    %c0_2 = arith.constant 0 : index
    %1 = vector.load %arg2[%c0_1, %c0_2] : memref<8x32xf32, #tpu.memory_space<vmem>>, vector<8x32xf32>
    %2 = arith.addf %0, %1 : vector<8x32xf32>
    %cst = arith.constant dense<0.000000e+00> : vector<8xf32>
    %3 = vector.multi_reduction <add>, %2, %cst [1] : vector<8x32xf32> to vector<8xf32>
    %4 = vector.shape_cast %3 : vector<8xf32> to vector<8x1xf32>
    %cst_3 = arith.constant 3.125000e-02 : f32
    %5 = vector.broadcast %cst_3 : f32 to vector<8x1xf32>
    %6 = arith.mulf %4, %5 : vector<8x1xf32>
    %7 = vector.broadcast %6 : vector<8x1xf32> to vector<8x32xf32>
    %8 = arith.subf %2, %7 : vector<8x32xf32>
    %9 = arith.mulf %8, %8 : vector<8x32xf32>
    %cst_4 = arith.constant dense<0.000000e+00> : vector<8xf32>
    %10 = vector.multi_reduction <add>, %9, %cst_4 [1] : vector<8x32xf32> to vector<8xf32>
    %11 = vector.shape_cast %10 : vector<8xf32> to vector<8x1xf32>
    %cst_5 = arith.constant 3.125000e-02 : f32
    %12 = vector.broadcast %cst_5 : f32 to vector<8x1xf32>
    %13 = arith.mulf %11, %12 : vector<8x1xf32>
    %cst_6 = arith.constant 9.99999974E-6 : f32
    %14 = vector.broadcast %cst_6 : f32 to vector<8x1xf32>
    %15 = arith.addf %13, %14 : vector<8x1xf32>
    %16 = math.rsqrt %15 : vector<8x1xf32>
    %17 = vector.broadcast %16 : vector<8x1xf32> to vector<8x32xf32>
    %18 = arith.mulf %8, %17 : vector<8x32xf32>
    %c0_7 = arith.constant 0 : index
    %c0_8 = arith.constant 0 : index
    %19 = vector.load %arg3[%c0_7, %c0_8] : memref<1x32xf32, #tpu.memory_space<vmem>>, vector<1x32xf32>
    %20 = vector.broadcast %19 : vector<1x32xf32> to vector<8x32xf32>
    %21 = arith.mulf %18, %20 : vector<8x32xf32>
    %c0_9 = arith.constant 0 : index
    %c0_10 = arith.constant 0 : index
    %22 = vector.load %arg4[%c0_9, %c0_10] : memref<1x32xf32, #tpu.memory_space<vmem>>, vector<1x32xf32>
    %23 = vector.broadcast %22 : vector<1x32xf32> to vector<8x32xf32>
    %24 = arith.addf %21, %23 : vector<8x32xf32>
    %c0_11 = arith.constant 0 : index
    %c0_12 = arith.constant 0 : index
    %25 = vector.load %arg5[%c0_11, %c0_12] : memref<8x32xf32, #tpu.memory_space<vmem>>, vector<8x32xf32>
    tpu.vector_store %arg5[%c0_11, %c0_12], %24 {strides = array<i32>} : memref<8x32xf32, #tpu.memory_space<vmem>>, vector<8x32xf32>,
    return
  }
  func.func @transform_0(%arg0: i32) -> (i32, i32) {
    %c0_i32 = arith.constant 0 : i32
    %c0_i32_0 = arith.constant 0 : i32
    return %arg0, %c0_i32 : i32, i32
  }
  func.func @transform_1(%arg0: i32) -> (i32, i32) {
    %c0_i32 = arith.constant 0 : i32
    %c0_i32_0 = arith.constant 0 : i32
    return %arg0, %c0_i32 : i32, i32
  }
  func.func @transform_2(%arg0: i32) -> (i32, i32) {
    %c0_i32 = arith.constant 0 : i32
    %c0_i32_0 = arith.constant 0 : i32
    %c0_i32_1 = arith.constant 0 : i32
    return %c0_i32, %c0_i32_0 : i32, i32
  }
  func.func @transform_3(%arg0: i32) -> (i32, i32) {
    %c0_i32 = arith.constant 0 : i32
    %c0_i32_0 = arith.constant 0 : i32
    %c0_i32_1 = arith.constant 0 : i32
    return %c0_i32, %c0_i32_0 : i32, i32
  }
  func.func @transform_4(%arg0: i32) -> (i32, i32) {
    %c0_i32 = arith.constant 0 : i32
    %c0_i32_0 = arith.constant 0 : i32
    return %arg0, %c0_i32 : i32, i32
  }
}

</mosaic_0001>

<bundles_post_ra>
// kernel: tpu_custom_call.1
= control target key start
LH: loop header
LB: loop body
LE: loop exit
PB: predicated region body
PF: predicated region fallthrough
CT: control target
= control target key end

     0   :  { %9 = vsyncpa [#allocation3], 0  ;;  %s844_s0 = inlined_call_operand.hbm [shape: f32[16,32], index: 0, kind: input, shape index: {}]   ;;  %s845_s1 = inlined_call_operand.hbm [shape: f32[16,32], index: 1, kind: input, shape index: {}]   ;;  %s846_s2 = inlined_call_operand.vmem [shape: f32[1,32], index: 2, kind: input, shape index: {}]   ;;  %s847_s3 = inlined_call_operand.vmem [shape: f32[1,32], index: 3, kind: input, shape index: {}]   ;;  %s848_s4 = inlined_call_operand.hbm [shape: f32[16,32], index: 4, kind: output, shape index: {}]  }
   0x1   :  { %11 = vsyncpa [#allocation3 + $0x1], 0 }
   0x2   :  { %12 = vsyncpa [#allocation6], 0 }
   0x3   :  { %14 = vsyncpa [#allocation6 + $0x1], 0 }
   0x4   :  { %15 = vsyncpa [#allocation4], 0 }
   0x5   :  { %17 = vsyncpa [#allocation4 + $0x1], 0  ;;  %s621_s15 = smov 0   ;;  %s623_s16 = smov 0  }
   0x6   :  { %s625_s17 = smov 0   ;;  %s627_s18 = smov 0  }
   0x7 LB: > { %s642_s19 = sadd.s32 4294967295, %s591_s18   ;;  %s391_s20 = sadd.s32 4294967294, %s591_s18   ;;  %s591_s18 = sphi %s627_s18, %s867_s18   ;;  %s587_s17 = sphi %s625_s17, %s866_s17   ;;  %s583_s16 = sphi %s623_s16, %s865_s16   ;;  %s579_s15 = sphi %s621_s15, %s864_s15  }
   0x8   : > { %s646_s21 = sadd.s32 1, %s591_s18   ;;  %s30_s22 = sadd.s32 1, %s587_s17 }
   0x9   : > { %s27_s23 = ssub.s32 %s591_s18, %s646_s21  ;;  %p37_p0 = scmp.ne.s32.totalorder %s587_s17, %s583_s16 }
   0xa   : > { %p28_p1 = scmp.eq.s32.totalorder %s27_s23, 0  ;;  %p38_p2 = scmp.eq.s32.totalorder %s591_s18, 0 }
   0xb   : > { %p43_p3 = scmp.ne.s32.totalorder %s583_s16, %s579_s15  ;;  %p44_p4 = scmp.eq.s32.totalorder %s642_s19, 0 }
   0xc   : > { %s658_s24 = scalar_select %p28_p1, %s587_s17, %s30_s22  }
   0xd   : > { %p660_p5 = por %p38_p2, %p37_p0  ;;  %p664_p6 = por %p44_p4, %p43_p3 }
   0xe   : > { %p135_p7 = scmp.eq.s32.totalorder %s642_s19, 1  ;;  %p141_p8 = scmp.eq.s32.totalorder %s391_s20, 1 }
   0xf   : > { %s852_s26 = scalar_select %p664_p6, 1, 0 }
  0x10   : > { %p425_p10 = scmp.lt.s32.totalorder %s591_s18, 2  ;;  %p671_p11 = por %p135_p7, %p37_p0 }
  0x11   : > { %p675_p12 = por %p141_p8, %p43_p3  ;;  %s680_s29 = sand.u32 1, %s587_s17  }
  0x12   : > { %s853_s27 = scalar_select %p671_p11, 1, 0 }
  0x13   : > { %s854_s28 = scalar_select %p675_p12, 1, 0 }
  0x14   : > { %s395_s30 = sshll.u32 %s591_s18, 7  ;;  %s394_s5 = sshll.u32 %s680_s29, 3 }
  0x15   : > { %s689_s8 = scalar_lea.hbm %s844_s0, %s395_s30  ;;  %s171_s9 = scalar_lea.vmem [#allocation2], %s394_s5 }
  0x16   : > { %s178_s10 = sshll.u32 %s171_s9, 4  ;;  %p695_p13 = pnand %p425_p10, %p660_p5  ;;  %s699_s10 = int_to_ptr.vmem [resolvable:$true] %s178_s10 }
  0x17   : > { %s168_s12 = scalar_lea.sflag [#allocation3], %s680_s29  ;;  %s461_s13 = scalar_lea.hbm %s689_s8, 128 }
  0x18   : > { %p462_p2 = scmp.ne.s32.totalorder %s689_s8, %s461_s13  ;;  %p463_p3 = pneg %p695_p13 }
  0x19   : > { %s466_s22 = scalar_lea.hbm %s844_s0, 256  ;;  %p467_p5 = scmp.lt.u32.totalorder %s689_s8, %s844_s0 }
  0x1a   : > { %p464_p4 = pnand %p463_p3, %p462_p2  ;;  %p468_p8 = scmp.lt.u32.totalorder %s466_s22, %s461_s13 }
  0x1b   : > { %p470_p9 = scmp.lt.u32.totalorder %s461_s13, %s689_s8 }
  0x1c   : > { %p465_p7 = pneg %p464_p4  ;;  %p469_p10 = por %p468_p8, %p467_p5 }
  0x1e   : > { %p471_p0 = por %p470_p9, %p469_p10 }
  0x20   : > { %p472_p1 = pnand %p471_p0, %p465_p7 }
  0x22   : > { %475 = shalt.err (!%p472_p1)
}
  0x23   : > { %s476_s6 = scalar_lea.vmem %s699_s10, 128  ;;  %s593_s7 = smov [#allocation2]  }
  0x24   : > { %p477_p2 = scmp.ne.s32.totalorder %s699_s10, %s476_s6  ;;  %s481_s9 = sshll.u32 %s593_s7, 4  ;;  %s482_s9 = int_to_ptr.vmem [resolvable:$false] %s481_s9 }
  0x25   : > { %s483_s14 = scalar_lea.vmem %s482_s9, 256  ;;  %p484_p11 = scmp.lt.s32.totalorder %s699_s10, %s482_s9 }
  0x26   : > { %p479_p4 = pnand %p477_p2, %p463_p3  ;;  %p485_p5 = scmp.lt.s32.totalorder %s483_s14, %s476_s6 }
  0x28   : > { %p480_p12 = pneg %p479_p4  ;;  %p486_p8 = por %p485_p5, %p484_p11 }
  0x2a   : > { %p487_p9 = pnand %p486_p8, %p480_p12 }
  0x2c   : > { %490 = shalt.err (!%p487_p9)
}
  0x2d   : > { %417 = dma.hbm_to_vmem [thread:$0]  (!%p695_p13), %s689_s8, 128, %s699_s10, %s168_s12  }
  0x2e   : > { %p856_p0 = scmp.lt.s32.totalorder %s591_s18, 3  ;;  %p857_p1 = scmp.ge.s32.totalorder %s591_s18, 1 }
  0x2f   : > { %s742_s23 = scalar_lea.hbm %s845_s1, %s395_s30  ;;  %s189_s25 = scalar_lea.vmem [#allocation5], %s394_s5 }
  0x30   : > { %p733_p7 = pnand %p857_p1, %p856_p0  ;;  %s196_s6 = sshll.u32 %s189_s25, 4  ;;  %s197_s6 = int_to_ptr.vmem [resolvable:$true] %s196_s6 }
  0x31   : > { %s186_s8 = scalar_lea.sflag [#allocation6], %s680_s29  ;;  %s491_s10 = scalar_lea.hbm %s742_s23, 128 }
  0x32   : > { %s858_s13 = scalar_select %p733_p7, 1, 0 }
  0x33   : > { %p492_p11 = scmp.ne.s32.totalorder %s742_s23, %s491_s10  ;;  %s496_s30 = scalar_lea.hbm %s845_s1, 256 }
  0x34   : > { %p497_p2 = scmp.lt.u32.totalorder %s742_s23, %s845_s1  ;;  %p498_p4 = scmp.lt.u32.totalorder %s496_s30, %s491_s10 }
  0x35   : > { %p494_p12 = pnand %p492_p11, %p463_p3  ;;  %p500_p8 = scmp.lt.u32.totalorder %s491_s10, %s742_s23 }
  0x36   : > { %p499_p5 = por %p498_p4, %p497_p2 }
  0x37   : > { %p495_p10 = pneg %p494_p12 }
  0x38   : > { %p501_p9 = por %p500_p8, %p499_p5 }
  0x3a   : > { %p502_p0 = pnand %p501_p9, %p495_p10 }
  0x3c   : > { %505 = shalt.err (!%p502_p0)
}
  0x3d   : > { %s506_s29 = scalar_lea.vmem %s197_s6, 128  ;;  %s594_s5 = smov [#allocation5]  }
  0x3e   : > { %p507_p1 = scmp.ne.s32.totalorder %s197_s6, %s506_s29  ;;  %s511_s20 = sshll.u32 %s594_s5, 4  ;;  %s512_s20 = int_to_ptr.vmem [resolvable:$false] %s511_s20 }
  0x3f   : > { %s513_s22 = scalar_lea.vmem %s512_s20, 256  ;;  %p514_p6 = scmp.lt.s32.totalorder %s197_s6, %s512_s20 }
  0x40   : > { %p509_p11 = pnand %p507_p1, %p463_p3  ;;  %p515_p7 = scmp.lt.s32.totalorder %s513_s22, %s506_s29 }
  0x42   : > { %p510_p12 = pneg %p509_p11  ;;  %p516_p2 = por %p515_p7, %p514_p6 }
  0x44   : > { %p517_p4 = pnand %p516_p2, %p510_p12 }
  0x46   : > { %520 = shalt.err (!%p517_p4)
}
  0x47   : > { %420 = dma.hbm_to_vmem [thread:$0]  (!%p695_p13), %s742_s23, 128, %s197_s6, %s186_s8  }
  0x48   : > { %p859_p10 = scmp.ne.s32.totalorder %s858_s13, 0 }
  0x49   : > { %s769_s25 = sand.u32 (!%p859_p10), 1, %s583_s16   ;;  %p860_p6 = scmp.ne.s32.totalorder (!%p859_p10), %s852_s26, 0 }
  0x4a   : > { %205 = sbr.rel (%p859_p10) target bundleno = 414 (0x19e), region = 36  ;;  %s772_s10 = sshll.u32 (!%p859_p10), %s769_s25, 3 }
  0x4b   : > { %s208_s12 = scalar_lea.sflag (!%p859_p10), [#allocation3], %s769_s25  ;;  %s211_s7 = scalar_lea.vmem (!%p859_p10), [#allocation2], %s772_s10 }
  0x51   : > { %566 = dma.done.wait (%p860_p6), %s208_s12, 128  }
  0x52   : > { %568 = vsyncadd (%p860_p6), %s208_s12, 4294967168  ;;  %s217_s11 = scalar_lea.sflag [#allocation6], %s769_s25  ;;  %s220_s13 = scalar_lea.vmem [#allocation5], %s772_s10 }
  0x53   : > { %570 = dma.done.wait (%p860_p6), %s217_s11, 128  }
  0x54   : > { %572 = vsyncadd (%p860_p6), %s217_s11, 4294967168  ;;  %v250_v0 = vld [vmem:[%s211_s7] sm:$0xff]  ;;  %v251_v1 = vld [vmem:[%s220_s13] sm:$0xff]  ;;  %vm253_vm0 = vcmask 261120   ;;  %s405_s30 = sshll.u32 %s642_s19, 7  ;;  %s249_s9 = scalar_lea.vmem [#allocation7], %s772_s10 }
  0x55   : > { %v252_v2 = vadd.f32 %v251_v1, %v250_v0  ;;  %v402_v13 = vld [vmem:[%s846_s2] ss:$0 sm:$0xff]  ;;  %s298_s14 = sshll.u32 %s249_s9, 4  ;;  %s799_s20 = scalar_lea.hbm %s848_s4, %s405_s30  ;;  %s801_s14 = int_to_ptr.vmem [resolvable:$true] %s298_s14 }
  0x56   : > { %v403_v15 = vld [vmem:[%s847_s3] ss:$0 sm:$0xff]  ;;  %s285_s22 = scalar_lea.sflag [#allocation4], %s769_s25  ;;  %s521_s12 = scalar_lea.vmem %s801_s14, 128 }
  0x57   : > { %v254_v3 = vsel %vm253_vm0, %v252_v2, 0.0  ;;  %p522_p13 = scmp.ne.s32.totalorder %s801_s14, %s521_s12  ;;  %p861_p3 = scmp.ne.s32.totalorder %s853_s27, 0 }
  0x58   : > { %255 = vadd.xlane.f32.xlu0 %v254_v3  ;;  %s595_s19 = smov [#allocation7]  }
  0x59   : > { %p523_p7 = pnand %p522_p13, %p861_p3  ;;  %s525_s10 = sshll.u32 %s595_s19, 4  ;;  %s526_s10 = int_to_ptr.vmem [resolvable:$false] %s525_s10 }
  0x5a   : > { %s527_s7 = scalar_lea.vmem %s526_s10, 256  ;;  %p528_p8 = scmp.lt.s32.totalorder %s801_s14, %s526_s10 }
  0x5b   : > { %p524_p5 = pneg %p523_p7  ;;  %p529_p9 = scmp.lt.s32.totalorder %s527_s7, %s521_s12 }
  0x5d   : > { %p530_p0 = por %p529_p9, %p528_p8 }
  0x5f   : > { %p531_p1 = pnand %p530_p0, %p524_p5 }
  0xe5   : > { %v256_v4 = vpop.xlane.xlu0 %255 }
  0xe6   : > { %v257_v5 = vmul.f32 0.03125, %v256_v4 }
  0xe8   : > { %v258_v6 = vsub.f32 %v252_v2, %v257_v5 }
  0xea   : > { %v259_v7 = vmul.f32 %v258_v6, %v258_v6 }
  0xec   : > { %v260_v8 = vsel %vm253_vm0, %v259_v7, 0.0 }
  0xed   : > { %261 = vadd.xlane.f32.xlu0 %v260_v8 }
 0x17a   : > { %v262_v9 = vpop.xlane.xlu0 %261 }
 0x17b   : > { %v263_v10 = vmul.f32 0.03125, %v262_v9 }
 0x17d   : > { %v264_v11 = vadd.f32 1e-05, %v263_v10 }
 0x17f   : > { %459 = vrsqrt.f32 %v264_v11 }
 0x189   : > { %v460_v12 = vpop.eup %459 }
 0x18a   : > { %v266_v14 = vmul.f32 %v460_v12, %v258_v6 }
 0x18c   : > { %v274_v16 = vmul.f32 %v402_v13, %v266_v14 }
 0x18e   : > { %v282_v17 = vadd.f32 %v403_v15, %v274_v16 }
 0x190   : > { %283 = vst.msk [vmem:[%s249_s9] sm:$0xff] %vm253_vm0, %v282_v17 }
 0x191   : > { %534 = shalt.err (!%p531_p1)
}
 0x192   : > { %s535_s25 = scalar_lea.hbm %s799_s20, 128  ;;  %s539_s26 = scalar_lea.hbm %s848_s4, 256 }
 0x193   : > { %p536_p11 = scmp.ne.s32.totalorder %s799_s20, %s535_s25  ;;  %p540_p4 = scmp.lt.u32.totalorder %s799_s20, %s848_s4 }
 0x194   : > { %p541_p10 = scmp.lt.u32.totalorder %s539_s26, %s535_s25  ;;  %p543_p13 = scmp.lt.u32.totalorder %s535_s25, %s799_s20 }
 0x195   : > { %p537_p12 = pnand %p536_p11, %p861_p3 }
 0x196   : > { %p542_p6 = por %p541_p10, %p540_p4 }
 0x197   : > { %p538_p2 = pneg %p537_p12 }
 0x198   : > { %p544_p7 = por %p543_p13, %p542_p6 }
 0x19a   : > { %p545_p5 = pnand %p544_p7, %p538_p2 }
 0x19c   : > { %548 = shalt.err (!%p545_p5)
}
 0x19d   : > { %412 = dma.vmem_to_hbm [thread:$0]  (%p861_p3), %s801_s14, 128, %s799_s20, %s285_s22  }
 0x19e PF: > { %s310_s8 = sand.u32 1, %s579_s15   ;;  %p862_p8 = scmp.ne.s32.totalorder %s854_s28, 0 }
 0x19f   : > { %p863_p9 = scmp.ge.s32.totalorder %s591_s18, 2  ;;  %s311_s30 = scalar_lea.sflag [#allocation4], %s310_s8 }
 0x1a1   : > { %p422_p0 = pnand %p863_p9, %p862_p8 }
 0x1a3   : > { %574 = dma.done.wait (!%p422_p0), %s311_s30, 128  }
 0x1a4   : > { %576 = vsyncadd (!%p422_p0), %s311_s30, 4294967168  ;;  %p20_p1 = scmp.ge.s32.totalorder %s646_s21, 4   ;;  %s864_s15 = smov %s583_s16 }
 0x1a5   : > { %s865_s16 = smov %s587_s17  ;;  %s866_s17 = smov %s658_s24 }
 0x1a6   : > { %s867_s18 = smov %s646_s21  ;;  %22 = sbr.rel (!%p20_p1) target bundleno = 7 (0x7), region = 94 }
 0x1ad   :  { %316 = vsyncpa [#allocation3], 1 }
 0x1ae   :  { %318 = vsyncpa [#allocation3 + $0x1], 1 }
 0x1af   :  { %319 = vsyncpa [#allocation6], 1 }
 0x1b0   :  { %321 = vsyncpa [#allocation6 + $0x1], 1 }
 0x1b1   :  { %322 = vsyncpa [#allocation4], 1 }
 0x1b2   :  { %324 = vsyncpa [#allocation4 + $0x1], 1 }

</bundles_post_ra>
